<compile_context>
chip_gen: v5e
topology: v5e:2x2
jax: 0.10.0
libtpu: 0.0.40
codegen_flags: <defaults>
</compile_context>

<pallas_src>
import jax
import jax.numpy as jnp
from jax.experimental import pallas as pl
from jax.experimental.pallas import tpu as pltpu

IN_F = 19
HID_F = 57
OUT_F = 1

# Max batch tile (lanes). With batch-on-lanes, TM=16384 uses ~13 MiB of VMEM
# (x double-buffer 2x1.5 MiB, h ~4-8 MiB, y 0.5 MiB, out double-buffer 1 MiB),
# comfortably inside every generation's VMEM including v7x (64 MiB physical).
TM_MAX = 16384
_SUB = 8      # sublanes of one f32 vreg
_LANE = 128   # lanes of one vreg


def _round_up(x, m):
    return (x + m - 1) // m * m


def _cdiv(a, b):
    return (a + b - 1) // b


def _mlp_kernel(xt_ref, w1_ref, b1_ref, w2_ref, b2_ref, o_ref):
    # fc1 on the MXU, batch on lanes: [57, 19] @ [19, TM] -> [57, TM] (f32 acc).
    h = jnp.dot(w1_ref[...], xt_ref[...], preferred_element_type=jnp.float32)
    # Bias + ReLU on the VPU; b1 is a [57, 1] column broadcast along lanes.
    h = jnp.maximum(h + b1_ref[...], 0.0)
    # fc2 on the MXU, standard orientation: [8, 57] @ [57, TM] -> [8, TM]
    # (w2 replicated across one sublane group; only row 0 is meaningful).
    y = jnp.dot(w2_ref[...], h, preferred_element_type=jnp.float32)
    # Lane-dense [1, TM] output row -> unmasked, contiguous HBM writeback.
    o_ref[...] = y[0:1, :] + b2_ref[0]   # b2 is a scalar read from SMEM


@jax.jit
def shallow_model_forward(x, w1, b1, w2, b2):
    """ShallowModel forward.

    x : [B, 19] float32
    w1: [57, 19]  (fc1.weight, PyTorch-native layout)
    b1: [57]      (fc1.bias)
    w2: [1, 57]   (fc2.weight, PyTorch-native layout)
    b2: [1]       (fc2.bias)
    returns [B, 1] float32
    """
    B = x.shape[0]
    # Balanced tiles: minimize tail padding for ragged batches.
    n_tiles = _cdiv(B, TM_MAX)
    tm = _round_up(_cdiv(B, n_tiles), _LANE)
    b_pad = n_tiles * tm

    # One wrapper-side transpose to feature-major [19, B_pad]; padded batch
    # columns are zeros (they compute relu(b1)·w2 + b2 garbage in the padded
    # region of the output row, which is stripped below).
    xt = jnp.pad(x.astype(jnp.float32).T, ((0, 0), (0, b_pad - B)))

    w1_f = w1.astype(jnp.float32)                                      # [57, 19]
    b1_col = jnp.reshape(b1, (HID_F, 1)).astype(jnp.float32)           # [57, 1]
    w2_blk = jnp.broadcast_to(
        jnp.reshape(w2, (1, HID_F)), (_SUB, HID_F)).astype(jnp.float32)  # [8, 57]
    b2_s = jnp.reshape(b2, (1,)).astype(jnp.float32)

    out_row = pl.pallas_call(
        _mlp_kernel,
        out_shape=jax.ShapeDtypeStruct((1, b_pad), jnp.float32),
        grid=(n_tiles,),
        in_specs=[
            # x (feature-major): one [19, tm] batch tile per grid step
            # (pipelined / double-buffered, dense sublanes).
            pl.BlockSpec((IN_F, tm), lambda i: (0, i)),
            # Weights & biases: constant block index -> DMA'd once, VMEM-resident.
            pl.BlockSpec((HID_F, IN_F), lambda i: (0, 0)),
            pl.BlockSpec((HID_F, 1), lambda i: (0, 0)),
            pl.BlockSpec((_SUB, HID_F), lambda i: (0, 0)),
            # b2: 4-byte scalar -> SMEM (no VMEM tile, no per-step DMA).
            pl.BlockSpec(memory_space=pltpu.MemorySpace.SMEM),
        ],
        # Lane-dense output slab: row 0 of a (1, B_pad) array, [1, tm] per step.
        out_specs=pl.BlockSpec((1, tm), lambda i: (0, i)),
        compiler_params=pltpu.CompilerParams(
            dimension_semantics=("parallel",),   # shard batch tiles across v7x's 2 TCs
            vmem_limit_bytes=48 * 1024 * 1024,   # explicit: v5e default is 16 MiB; <=48 MiB for v7x
        ),
    )(xt, w1_f, b1_col, w2_blk, b2_s)

    # Strip batch padding and restore the [B, 1] PyTorch output shape.
    return out_row[0, :B, None]


def init_params(key):
    """Deterministic init mirroring torch.nn.Linear default U[-1/sqrt(fan_in), +]."""
    k1, k2, k3, k4 = jax.random.split(key, 4)
    bound1 = 1.0 / (IN_F ** 0.5)
    bound2 = 1.0 / (HID_F ** 0.5)
    w1 = jax.random.uniform(k1, (HID_F, IN_F), jnp.float32, -bound1, bound1)   # fc1.weight
    b1 = jax.random.uniform(k2, (HID_F,), jnp.float32, -bound1, bound1)        # fc1.bias
    w2 = jax.random.uniform(k3, (OUT_F, HID_F), jnp.float32, -bound2, bound2)  # fc2.weight
    b2 = jax.random.uniform(k4, (OUT_F,), jnp.float32, -bound2, bound2)        # fc2.bias
    return w1, b1, w2, b2


def _reference(x, w1, b1, w2, b2):
    return jnp.maximum(x @ w1.T + b1, 0.0) @ w2.T + b2


if __name__ == "__main__":
    key = jax.random.PRNGKey(0)
    k_params, k_x1, k_x2, k_x3 = jax.random.split(key, 4)
    w1, b1, w2, b2 = init_params(k_params)

    # Small batch (single tile, exercises padding 8 -> 128 lanes).
    batch = 8
    x = jax.random.normal(k_x1, (batch, IN_F), jnp.float32)
    out = jax.block_until_ready(shallow_model_forward(x, w1, b1, w2, b2))
    ref = _reference(x, w1, b1, w2, b2)
    assert out.shape == (batch, OUT_F), out.shape
    assert jnp.allclose(out, ref, atol=1e-4, rtol=1e-4)

    # Ragged batch: balanced tile => 2100 pads to 2176 (was 4096 before).
    batch2 = 2100
    x2 = jax.random.normal(k_x2, (batch2, IN_F), jnp.float32)
    out2 = jax.block_until_ready(shallow_model_forward(x2, w1, b1, w2, b2))
    ref2 = _reference(x2, w1, b1, w2, b2)
    assert out2.shape == (batch2, OUT_F), out2.shape
    assert jnp.allclose(out2, ref2, atol=1e-4, rtol=1e-4)

    # Batch > TM_MAX: exercises the multi-step grid path with balanced tiles
    # (n_tiles=2, tm=8320, b_pad=16640).
    batch3 = 16500
    x3 = jax.random.normal(k_x3, (batch3, IN_F), jnp.float32)
    out3 = jax.block_until_ready(shallow_model_forward(x3, w1, b1, w2, b2))
    ref3 = _reference(x3, w1, b1, w2, b2)
    assert out3.shape == (batch3, OUT_F), out3.shape
    assert jnp.allclose(out3, ref3, atol=1e-4, rtol=1e-4)

    print("KERNEL_OK")
</pallas_src>

<mosaic_0001>
module attributes {stable_mosaic.version = 11 : i64} {
  func.func @_mlp_kernel(%arg0: i32, %arg1: memref<19x128xf32, #tpu.memory_space<vmem>>, %arg2: memref<57x19xf32, #tpu.memory_space<vmem>>, %arg3: memref<57x1xf32, #tpu.memory_space<vmem>>, %arg4: memref<8x57xf32, #tpu.memory_space<vmem>>, %arg5: memref<1xf32, #tpu.memory_space<smem>>, %arg6: memref<1x128xf32, #tpu.memory_space<vmem>>) attributes {dimension_semantics = [#tpu.dimension_semantics<parallel>], iteration_bounds = array<i64: 1>, scalar_prefetch = 0 : i64, scratch_operands = 0 : i64, tpu.core_type = #tpu.core_type<tc>, window_params = [{transform_indices = @transform_0, window_bounds = array<i64: 19, 128>}, {pipeline_mode = #tpu.pipeline_mode<synchronous>, transform_indices = @transform_1, window_bounds = array<i64: 57, 19>}, {pipeline_mode = #tpu.pipeline_mode<synchronous>, transform_indices = @transform_2, window_bounds = array<i64: 57, 1>}, {pipeline_mode = #tpu.pipeline_mode<synchronous>, transform_indices = @transform_3, window_bounds = array<i64: 8, 57>}, {transform_indices = @transform_4, window_bounds = array<i64: 1>}, {transform_indices = @transform_5, window_bounds = array<i64: 1, 128>}]} {
    %c0 = arith.constant 0 : index
    %c0_0 = arith.constant 0 : index
    %0 = vector.load %arg2[%c0, %c0_0] : memref<57x19xf32, #tpu.memory_space<vmem>>, vector<57x19xf32>
    %c0_1 = arith.constant 0 : index
    %c0_2 = arith.constant 0 : index
    %1 = vector.load %arg1[%c0_1, %c0_2] : memref<19x128xf32, #tpu.memory_space<vmem>>, vector<19x128xf32>
    %cst = arith.constant dense<0.000000e+00> : vector<57x128xf32>
    %2 = tpu.matmul %0, %1, %cst {dimension_numbers = #tpu.dot_dimension_numbers<[1], [0], [0], [1], [0, 0, 1, 1], [], []>} : vector<57x19xf32>, vector<19x128xf32>, vector<57x128xf32> -> vector<57x128xf32>
    %c0_3 = arith.constant 0 : index
    %c0_4 = arith.constant 0 : index
    %3 = vector.load %arg3[%c0_3, %c0_4] : memref<57x1xf32, #tpu.memory_space<vmem>>, vector<57x1xf32>
    %4 = vector.broadcast %3 : vector<57x1xf32> to vector<57x128xf32>
    %5 = arith.addf %2, %4 : vector<57x128xf32>
    %cst_5 = arith.constant 0.000000e+00 : f32
    %6 = vector.broadcast %cst_5 : f32 to vector<57x128xf32>
    %7 = arith.maximumf %5, %6 : vector<57x128xf32>
    %c0_6 = arith.constant 0 : index
    %c0_7 = arith.constant 0 : index
    %8 = vector.load %arg4[%c0_6, %c0_7] : memref<8x57xf32, #tpu.memory_space<vmem>>, vector<8x57xf32>
    %cst_8 = arith.constant dense<0.000000e+00> : vector<8x128xf32>
    %9 = tpu.matmul %8, %7, %cst_8 {dimension_numbers = #tpu.dot_dimension_numbers<[1], [0], [0], [1], [0, 0, 1, 1], [], []>} : vector<8x57xf32>, vector<57x128xf32>, vector<8x128xf32> -> vector<8x128xf32>
    %10 = vector.extract_strided_slice %9 {offsets = [0, 0], sizes = [1, 128], strides = [1, 1]} : vector<8x128xf32> to vector<1x128xf32>
    %c0_9 = arith.constant 0 : index
    %11 = memref.load %arg5[%c0_9] : memref<1xf32, #tpu.memory_space<smem>>
    %12 = vector.broadcast %11 : f32 to vector<1x128xf32>
    %13 = arith.addf %10, %12 : vector<1x128xf32>
    %c0_10 = arith.constant 0 : index
    %c0_11 = arith.constant 0 : index
    %14 = vector.load %arg6[%c0_10, %c0_11] : memref<1x128xf32, #tpu.memory_space<vmem>>, vector<1x128xf32>
    tpu.vector_store %arg6[%c0_10, %c0_11], %13 {strides = array<i32>} : memref<1x128xf32, #tpu.memory_space<vmem>>, vector<1x128xf32>,
    return
  }
  func.func @transform_0(%arg0: i32) -> (i32, i32) {
    %c0_i32 = arith.constant 0 : i32
    %c0_i32_0 = arith.constant 0 : i32
    return %c0_i32, %arg0 : i32, i32
  }
  func.func @transform_1(%arg0: i32) -> (i32, i32) {
    %c0_i32 = arith.constant 0 : i32
    %c0_i32_0 = arith.constant 0 : i32
    %c0_i32_1 = arith.constant 0 : i32
    return %c0_i32, %c0_i32_0 : i32, i32
  }
  func.func @transform_2(%arg0: i32) -> (i32, i32) {
    %c0_i32 = arith.constant 0 : i32
    %c0_i32_0 = arith.constant 0 : i32
    %c0_i32_1 = arith.constant 0 : i32
    return %c0_i32, %c0_i32_0 : i32, i32
  }
  func.func @transform_3(%arg0: i32) -> (i32, i32) {
    %c0_i32 = arith.constant 0 : i32
    %c0_i32_0 = arith.constant 0 : i32
    %c0_i32_1 = arith.constant 0 : i32
    return %c0_i32, %c0_i32_0 : i32, i32
  }
  func.func @transform_4(%arg0: i32) -> i32 {
    %c0_i32 = arith.constant 0 : i32
    %c0_i32_0 = arith.constant 0 : i32
    return %c0_i32 : i32
  }
  func.func @transform_5(%arg0: i32) -> (i32, i32) {
    %c0_i32 = arith.constant 0 : i32
    %c0_i32_0 = arith.constant 0 : i32
    return %c0_i32, %arg0 : i32, i32
  }
}

</mosaic_0001>

<bundles_post_ra>
// kernel: shallow_model_forward.1
= control target key start
LH: loop header
LB: loop body
LE: loop exit
PB: predicated region body
PF: predicated region fallthrough
CT: control target
= control target key end

     0   :  { %vm105_vm0 = vcmask 1042432   ;;  %v216_v2 = vmov 0   ;;  %vm80_vm1 = vcmask 154624   ;;  %vm163_vm2 = vcmask 1040384   ;;  %s321_s0 = inlined_call_operand.vmem [shape: f32[19,128], index: 0, kind: input, shape index: {}]   ;;  %s322_s2 = inlined_call_operand.vmem [shape: f32[57,1], index: 2, kind: input, shape index: {}]   ;;  %s323_s1 = inlined_call_operand.vmem [shape: f32[57,19], index: 1, kind: input, shape index: {}]   ;;  %s324_s3 = inlined_call_operand.vmem [shape: f32[8,57], index: 3, kind: input, shape index: {}]   ;;  %s325_s4 = inlined_call_operand.<no memory space> [shape: f32[1], index: 4, kind: input, shape index: {}]   ;;  %s326_s5 = inlined_call_operand.vmem [shape: f32[1,128], index: 5, kind: output, shape index: {}]  }
   0x1   :  { %v31_v0 = vld [vmem:[%s321_s0 + $0x10] sm:$0x7]  ;;  %v30_v1 = vld [vmem:[%s321_s0 + $0x8] sm:$0xff]  ;;  %214 = vset.pattern.permute.xlu1 %v216_v2  ;;  %213 = vset.pattern.permute.xlu0 %v216_v2  ;;  %v29_v3 = vld [vmem:[%s321_s0] sm:$0xff]  ;;  %vm159_vm3 = vcmask 465920   ;;  %v188_v53 = vstv %s325_s4 }
   0x2   :  { %206 = vmatpush.msk.msra.mxu2 %vm105_vm0, %v31_v0  ;;  %207 = vmatpush.msk.msra.mxu3 %vm105_vm0, %v31_v0  ;;  %v39_v4 = vld [vmem:[%s322_s2 + $0x38] sm:$0x1]  ;;  %v27_v6 = vld [vmem:[%s323_s1 + $0x30] sm:$0xff]  ;;  %v37_v7 = vld [vmem:[%s322_s2 + $0x28] sm:$0xff] }
   0x3   :  { %195 = vmatpush.msk.msra.mxu0 %vm105_vm0, %v31_v0  ;;  %215 = vset.pattern.permute.xlu2 %v216_v2  ;;  %v24_v5 = vld [vmem:[%s323_s1 + $0x18] sm:$0xff]  ;;  %v21_v8 = vld [vmem:[%s323_s1] sm:$0xff]  ;;  %v38_v10 = vld [vmem:[%s322_s2 + $0x30] sm:$0xff] }
   0x4   :  { %208 = vmatpush.msra.mxu2 %v30_v1  ;;  %209 = vmatpush.msra.mxu3 %v30_v1  ;;  %v35_v9 = vld [vmem:[%s322_s2 + $0x18] sm:$0xff]  ;;  %v25_v11 = vld [vmem:[%s323_s1 + $0x20] sm:$0xff]  ;;  %v22_v14 = vld [vmem:[%s323_s1 + $0x8] sm:$0xff] }
   0x5   :  { %123 = vmatpush.msra.mxu0 %v30_v1  ;;  %77 = vperm.xlu0 %213, %v39_v4   ;;  %v28_v12 = vld [vmem:[%s323_s1 + $0x38] sm:$0x1]  ;;  %v36_v13 = vld [vmem:[%s322_s2 + $0x20] sm:$0xff]  ;;  %v34_v15 = vld [vmem:[%s322_s2 + $0x10] sm:$0xff] }
   0x6   :  { %210 = vmatpush.msra.mxu2 %v29_v3  ;;  %211 = vmatpush.msra.mxu3 %v29_v3  ;;  %v33_v16 = vld [vmem:[%s322_s2 + $0x8] sm:$0xff]  ;;  %v32_v18 = vld [vmem:[%s322_s2] sm:$0xff]  ;;  %v23_v19 = vld [vmem:[%s323_s1 + $0x10] sm:$0xff] }
   0x7   :  { %199 = vmatmul.msk.f32.vlgmr.msra.gmra.mxu2 %vm80_vm1, %v24_v5  ;;  %202 = vmatmul.msk.f32.vlgmr.msra.gmra.mxu3 %vm80_vm1, %v27_v6  ;;  %v26_v17 = vld [vmem:[%s323_s1 + $0x28] sm:$0xff]  ;;  %v158_v52 = vld [vmem:[%s324_s3] sm:$0xff] }
   0x8   :  { %124 = vmatpush.msra.mxu0 %v29_v3  ;;  %67 = vperm.xlu1 %214, %v37_v7  }
   0x9   :  { %196 = vmatmul.msk.f32.vlgmr.msra.gmra.mxu0 %vm80_vm1, %v21_v8  ;;  %57 = vperm.xlu2 %215, %v35_v9  }
   0xd   :  { %72 = vperm.xlu0 %213, %v38_v10  }
   0xf   :  { %200 = vmatmul.msk.f32.gmra.mxu2 %vm80_vm1, %v25_v11  ;;  %203 = vmatmul.msk.f32.gmra.mxu3 %vm80_vm1, %v28_v12 }
  0x10   :  { %62 = vperm.xlu1 %214, %v36_v13  }
  0x11   :  { %197 = vmatmul.msk.f32.gmra.mxu0 %vm80_vm1, %v22_v14  ;;  %52 = vperm.xlu2 %215, %v34_v15  }
  0x15   :  { %47 = vperm.xlu0 %213, %v33_v16  }
  0x17   :  { %201 = vmatmul.msk.f32.gmra.mxu2 %vm80_vm1, %v26_v17 }
  0x18   :  { %42 = vperm.xlu1 %214, %v32_v18  }
  0x19   :  { %198 = vmatmul.msk.f32.gmra.mxu0 %vm80_vm1, %v23_v19 }
  0x63   :  { %v58_v31 = vpop.permute.xlu2 %57 }
  0x6b   :  { %v53_v38 = vpop.permute.xlu2 %52 }
  0x77   :  { %v78_v20 = vpop.permute.xlu0 %77 }
  0x7a   :  { %v68_v24 = vpop.permute.xlu1 %67 }
  0x7f   :  { %v73_v25 = vpop.permute.xlu0 %72 }
  0x82   :  { %v63_v33 = vpop.permute.xlu1 %62 }
  0x86   :  { %v126_v21 = vpop.f32.mrf.mxu0 }
  0x87   :  { %v48_v42 = vpop.permute.xlu0 %47 }
  0x8a   :  { %v135_v22 = vpop.f32.mrf.mxu2  ;;  %v144_v23 = vpop.f32.mrf.mxu3 }
  0x8b   :  { %v145_v29 = vadd.f32 %v144_v23, %v73_v25  ;;  %v136_v40 = vadd.f32 %v135_v22, %v58_v31  ;;  %v43_v45 = vpop.permute.xlu1 %42 }
  0x8c   :  { %v127_v48 = vadd.f32 %v126_v21, %v43_v45 }
  0x8d   :  { %v156_v34 = vmax.f32 %v145_v29, 0.0  ;;  %v153_v46 = vmax.f32 %v136_v40, 0.0 }
  0x8e   :  { %v129_v26 = vpop.f32.mrf.mxu0  ;;  %v150_v51 = vmax.f32 %v127_v48, 0.0 }
  0x8f   :  { %v130_v47 = vadd.f32 %v129_v26, %v48_v42 }
  0x91   :  { %v151_v50 = vmax.f32 %v130_v47, 0.0 }
  0x92   :  { %v138_v27 = vpop.f32.mrf.mxu2  ;;  %v147_v28 = vpop.f32.mrf.mxu3 }
  0x93   :  { %v148_v30 = vadd.f32 %v147_v28, %v78_v20  ;;  %v139_v36 = vadd.f32 %v138_v27, %v63_v33 }
  0x95   :  { %v157_v32 = vmax.f32 %v148_v30, 0.0  ;;  %v154_v43 = vmax.f32 %v139_v36, 0.0 }
  0x96   :  { %v132_v39 = vpop.f32.mrf.mxu0 }
  0x97   :  { %204 = vmatpush.msk.msra.mxu1 %vm163_vm2, %v157_v32  ;;  %v133_v44 = vadd.f32 %v132_v39, %v53_v38 }
  0x99   :  { %176 = vmatpush.msra.mxu1 %v156_v34  ;;  %v152_v49 = vmax.f32 %v133_v44, 0.0 }
  0x9a   :  { %v141_v35 = vpop.f32.mrf.mxu2 }
  0x9b   :  { %v142_v37 = vadd.f32 %v141_v35, %v68_v24 }
  0x9d   :  { %v155_v41 = vmax.f32 %v142_v37, 0.0 }
  0x9f   :  { %177 = vmatpush.msra.mxu1 %v155_v41 }
  0xa1   :  { %178 = vmatpush.msra.mxu1 %v154_v43 }
  0xa3   :  { %179 = vmatpush.msra.mxu1 %v153_v46 }
  0xa5   :  { %180 = vmatpush.msra.mxu1 %v152_v49 }
  0xa7   :  { %181 = vmatpush.msra.mxu1 %v151_v50 }
  0xa9   :  { %182 = vmatpush.msra.mxu1 %v150_v51 }
  0xaa   :  { %205 = vmatmul.msk.f32.vlgmr.msra.gmra.mxu1 %vm159_vm3, %v158_v52 }
 0x127   :  { %v184_v54 = vpop.f32.mrf.mxu1 }
 0x128   :  { %v189_v55 = vadd.f32 %v188_v53, %v184_v54 }
 0x12a   :  { %190 = vst [vmem:[%s326_s5] sm:$0x1] %v189_v55 }

</bundles_post_ra>
